<compile_context>
chip_gen: v7x
topology: tpu7x:2x2x1
jax: 0.10.0
libtpu: 0.0.40
codegen_flags: <defaults>
</compile_context>

<pallas_src>
import jax
import jax.numpy as jnp
from jax.experimental import pallas as pl
from jax.experimental.pallas import tpu as pltpu


# ----------------------- hyperparameters (HP) -----------------------
class HP:
    R = 4                  # number of rank terms
    Lh1_2d_inputdim = 32   # D1
    Lh1_2d_outputdim = 128
    Lh2_inputdim = 64      # D2
    Lh2_outputdim = 128    # must equal Lh1_2d_outputdim for the elementwise mul


# ----------------------------- kernel -------------------------------
def mtfusion_kernel(x1_ref, x2_ref, w1_ref, w2_ref, o_ref):
    """One grid step processes a row tile of the batch.

    x1_ref: (TB, D1)        w1_ref: (D1+1, R*Dout)  -- last row = folded bias
    x2_ref: (TB, D2)        w2_ref: (D2+1, R*Dout)  -- last row = folded bias
    o_ref : (TB, Dout)
    """
    d1 = x1_ref.shape[-1]
    d2 = x2_ref.shape[-1]

    # Two wide MXU matmuls (N = R*Dout, lane-dense) + one broadcast bias add
    # each (bias row lives in the same VMEM slab as the weights).
    h1 = jnp.dot(x1_ref[...], w1_ref[0:d1, :],
                 preferred_element_type=jnp.float32) + w1_ref[d1:d1 + 1, :]
    h2 = jnp.dot(x2_ref[...], w2_ref[0:d2, :],
                 preferred_element_type=jnp.float32) + w2_ref[d2:d2 + 1, :]

    prod = h2 * h1                               # (TB, R*Dout), f32 in vregs

    dout = o_ref.shape[-1]
    r = prod.shape[-1] // dout
    # Reduce over the R rank terms with static, 128-aligned lane-chunk slices
    # (pairwise tree; stays on the VPU, no relayout).
    chunks = [prod[:, i * dout:(i + 1) * dout] for i in range(r)]
    while len(chunks) > 1:
        nxt = [chunks[i] + chunks[i + 1] for i in range(0, len(chunks) - 1, 2)]
        if len(chunks) % 2:
            nxt.append(chunks[-1])
        chunks = nxt

    o_ref[...] = chunks[0].astype(o_ref.dtype)


# ------------------- one-time parameter folding ---------------------
def prepare_mtfusion_params(w1, b1, w2, b2):
    """Fold the 2R PyTorch-layout Linear params ONCE (init time, not per call).

    w1: (R, Dout, D1), b1: (R, Dout)   (nn.Linear layout: weight = (out, in))
    w2: (R, Dout, D2), b2: (R, Dout)
    Returns:
      w1_aug: (D1+1, R*Dout), w2_aug: (D2+1, R*Dout) with the bias as last row.
    """
    R, Dout, D1 = w1.shape
    _, _, D2 = w2.shape
    w1f = jnp.transpose(w1, (2, 0, 1)).reshape(D1, R * Dout)
    w2f = jnp.transpose(w2, (2, 0, 1)).reshape(D2, R * Dout)
    b1f = b1.reshape(1, R * Dout)
    b2f = b2.reshape(1, R * Dout)
    return (jnp.concatenate([w1f, b1f], axis=0),
            jnp.concatenate([w2f, b2f], axis=0))


# ----------------------------- wrapper -------------------------------
def mtfusion(x1, x2, w1_aug, w2_aug, dout=HP.Lh1_2d_outputdim, row_tile=1024):
    """
    x1: (B, D1) f32 ; x2: (B, D2) f32
    w1_aug: (D1+1, R*Dout) ; w2_aug: (D2+1, R*Dout)   (from prepare_mtfusion_params)
    returns: (B, Dout) f32
    """
    B, D1 = x1.shape
    _, D2 = x2.shape
    rdout = w1_aug.shape[1]
    assert w1_aug.shape == (D1 + 1, rdout)
    assert w2_aug.shape == (D2 + 1, rdout)
    assert rdout % dout == 0

    # Row tile over the batch: whole batch for small B; 1024-row tiles (8- and
    # VMEM-friendly) once B grows, with weights kept full-resident per step.
    tb = B if B <= row_tile else row_tile
    bp = pl.cdiv(B, tb) * tb
    if bp != B:
        x1p = jnp.pad(x1, ((0, bp - B), (0, 0)))
        x2p = jnp.pad(x2, ((0, bp - B), (0, 0)))
    else:
        x1p, x2p = x1, x2

    flops = 2 * bp * (D1 + D2) * rdout + 2 * bp * rdout
    bytes_accessed = 4 * (x1p.size + x2p.size + w1_aug.size + w2_aug.size
                          + bp * dout)

    out = pl.pallas_call(
        mtfusion_kernel,
        out_shape=jax.ShapeDtypeStruct((bp, dout), x1.dtype),
        grid=(bp // tb,),
        in_specs=[
            pl.BlockSpec((tb, D1), lambda i: (i, 0)),
            pl.BlockSpec((tb, D2), lambda i: (i, 0)),
            pl.BlockSpec((D1 + 1, rdout), lambda i: (0, 0)),   # weights resident
            pl.BlockSpec((D2 + 1, rdout), lambda i: (0, 0)),   # weights resident
        ],
        out_specs=pl.BlockSpec((tb, dout), lambda i: (i, 0)),
        compiler_params=pltpu.CompilerParams(
            dimension_semantics=("parallel",)),      # shard B across TCs on v7x
        cost_estimate=pl.CostEstimate(
            flops=flops, bytes_accessed=bytes_accessed, transcendentals=0),
    )(x1p, x2p, w1_aug, w2_aug)

    return out if bp == B else out[:B]


# --------------------------- reference ------------------------------
def mtfusion_ref(x1, x2, w1, b1, w2, b2):
    # PyTorch layout: w (R, Dout, Din), b (R, Dout);  Linear(x) = x @ W^T + b
    h1 = jnp.einsum("bd,rod->rbo", x1, w1) + b1[:, None, :]
    h2 = jnp.einsum("bd,rod->rbo", x2, w2) + b2[:, None, :]
    return (h2 * h1).sum(axis=0)


# ------------------------------ main --------------------------------
if __name__ == "__main__":
    B = 8
    D1, D2, Dout, R = (HP.Lh1_2d_inputdim, HP.Lh2_inputdim,
                       HP.Lh1_2d_outputdim, HP.R)

    key = jax.random.PRNGKey(0)
    k1, k2, k3, k4, k5, k6 = jax.random.split(key, 6)

    # Deterministic synthetic inputs / parameters (nn.Linear layout).
    x1 = jax.random.normal(k1, (B, D1), dtype=jnp.float32)
    x2 = jax.random.normal(k2, (B, D2), dtype=jnp.float32)
    w1 = jax.random.normal(k3, (R, Dout, D1), dtype=jnp.float32) * 0.05
    b1 = jax.random.normal(k4, (R, Dout), dtype=jnp.float32) * 0.05
    w2 = jax.random.normal(k5, (R, Dout, D2), dtype=jnp.float32) * 0.05
    b2 = jax.random.normal(k6, (R, Dout), dtype=jnp.float32) * 0.05

    # One-time (init) fold of the 2R Linear layers -> two augmented weight slabs.
    w1_aug, w2_aug = jax.block_until_ready(
        prepare_mtfusion_params(w1, b1, w2, b2))

    fused = jax.jit(mtfusion)
    out = jax.block_until_ready(fused(x1, x2, w1_aug, w2_aug))

    ref = mtfusion_ref(x1, x2, w1, b1, w2, b2)
    assert out.shape == (B, Dout)
    assert jnp.allclose(out, ref, atol=1e-4, rtol=1e-4), "mismatch vs reference"

    print("KERNEL_OK")
</pallas_src>

<mosaic_0001>
module attributes {stable_mosaic.version = 11 : i64} {
  func.func @mtfusion_kernel(%arg0: i32, %arg1: memref<8x32xf32, #tpu.memory_space<vmem>>, %arg2: memref<8x64xf32, #tpu.memory_space<vmem>>, %arg3: memref<33x512xf32, #tpu.memory_space<vmem>>, %arg4: memref<65x512xf32, #tpu.memory_space<vmem>>, %arg5: memref<8x128xf32, #tpu.memory_space<vmem>>) attributes {dimension_semantics = [#tpu.dimension_semantics<parallel>], iteration_bounds = array<i64: 1>, scalar_prefetch = 0 : i64, scratch_operands = 0 : i64, tpu.core_type = #tpu.core_type<tc>, window_params = [{transform_indices = @transform_0, window_bounds = array<i64: 8, 32>}, {transform_indices = @transform_1, window_bounds = array<i64: 8, 64>}, {pipeline_mode = #tpu.pipeline_mode<synchronous>, transform_indices = @transform_2, window_bounds = array<i64: 33, 512>}, {pipeline_mode = #tpu.pipeline_mode<synchronous>, transform_indices = @transform_3, window_bounds = array<i64: 65, 512>}, {transform_indices = @transform_4, window_bounds = array<i64: 8, 128>}]} {
    %c0 = arith.constant 0 : index
    %c0_0 = arith.constant 0 : index
    %0 = vector.load %arg1[%c0, %c0_0] : memref<8x32xf32, #tpu.memory_space<vmem>>, vector<8x32xf32>
    %c0_1 = arith.constant 0 : index
    %c0_2 = arith.constant 0 : index
    %1 = vector.load %arg3[%c0_1, %c0_2] : memref<33x512xf32, #tpu.memory_space<vmem>>, vector<32x512xf32>
    %cst = arith.constant dense<0.000000e+00> : vector<8x512xf32>
    %2 = tpu.matmul %0, %1, %cst {dimension_numbers = #tpu.dot_dimension_numbers<[1], [0], [0], [1], [0, 0, 1, 1], [], []>} : vector<8x32xf32>, vector<32x512xf32>, vector<8x512xf32> -> vector<8x512xf32>
    %c32 = arith.constant 32 : index
    %c0_3 = arith.constant 0 : index
    %3 = vector.load %arg3[%c32, %c0_3] : memref<33x512xf32, #tpu.memory_space<vmem>>, vector<1x512xf32>
    %4 = vector.broadcast %3 : vector<1x512xf32> to vector<8x512xf32>
    %5 = arith.addf %2, %4 : vector<8x512xf32>
    %c0_4 = arith.constant 0 : index
    %c0_5 = arith.constant 0 : index
    %6 = vector.load %arg2[%c0_4, %c0_5] : memref<8x64xf32, #tpu.memory_space<vmem>>, vector<8x64xf32>
    %c0_6 = arith.constant 0 : index
    %c0_7 = arith.constant 0 : index
    %7 = vector.load %arg4[%c0_6, %c0_7] : memref<65x512xf32, #tpu.memory_space<vmem>>, vector<64x512xf32>
    %cst_8 = arith.constant dense<0.000000e+00> : vector<8x512xf32>
    %8 = tpu.matmul %6, %7, %cst_8 {dimension_numbers = #tpu.dot_dimension_numbers<[1], [0], [0], [1], [0, 0, 1, 1], [], []>} : vector<8x64xf32>, vector<64x512xf32>, vector<8x512xf32> -> vector<8x512xf32>
    %c64 = arith.constant 64 : index
    %c0_9 = arith.constant 0 : index
    %9 = vector.load %arg4[%c64, %c0_9] : memref<65x512xf32, #tpu.memory_space<vmem>>, vector<1x512xf32>
    %10 = vector.broadcast %9 : vector<1x512xf32> to vector<8x512xf32>
    %11 = arith.addf %8, %10 : vector<8x512xf32>
    %12 = arith.mulf %11, %5 : vector<8x512xf32>
    %13 = vector.extract_strided_slice %12 {offsets = [0, 0], sizes = [8, 128], strides = [1, 1]} : vector<8x512xf32> to vector<8x128xf32>
    %14 = vector.extract_strided_slice %12 {offsets = [0, 128], sizes = [8, 128], strides = [1, 1]} : vector<8x512xf32> to vector<8x128xf32>
    %15 = vector.extract_strided_slice %12 {offsets = [0, 256], sizes = [8, 128], strides = [1, 1]} : vector<8x512xf32> to vector<8x128xf32>
    %16 = vector.extract_strided_slice %12 {offsets = [0, 384], sizes = [8, 128], strides = [1, 1]} : vector<8x512xf32> to vector<8x128xf32>
    %17 = arith.addf %13, %14 : vector<8x128xf32>
    %18 = arith.addf %15, %16 : vector<8x128xf32>
    %19 = arith.addf %17, %18 : vector<8x128xf32>
    %c0_10 = arith.constant 0 : index
    %c0_11 = arith.constant 0 : index
    %20 = vector.load %arg5[%c0_10, %c0_11] : memref<8x128xf32, #tpu.memory_space<vmem>>, vector<8x128xf32>
    tpu.vector_store %arg5[%c0_10, %c0_11], %19 {strides = array<i32>} : memref<8x128xf32, #tpu.memory_space<vmem>>, vector<8x128xf32>,
    return
  }
  func.func @transform_0(%arg0: i32) -> (i32, i32) {
    %c0_i32 = arith.constant 0 : i32
    %c0_i32_0 = arith.constant 0 : i32
    return %arg0, %c0_i32 : i32, i32
  }
  func.func @transform_1(%arg0: i32) -> (i32, i32) {
    %c0_i32 = arith.constant 0 : i32
    %c0_i32_0 = arith.constant 0 : i32
    return %arg0, %c0_i32 : i32, i32
  }
  func.func @transform_2(%arg0: i32) -> (i32, i32) {
    %c0_i32 = arith.constant 0 : i32
    %c0_i32_0 = arith.constant 0 : i32
    %c0_i32_1 = arith.constant 0 : i32
    return %c0_i32, %c0_i32_0 : i32, i32
  }
  func.func @transform_3(%arg0: i32) -> (i32, i32) {
    %c0_i32 = arith.constant 0 : i32
    %c0_i32_0 = arith.constant 0 : i32
    %c0_i32_1 = arith.constant 0 : i32
    return %c0_i32, %c0_i32_0 : i32, i32
  }
  func.func @transform_4(%arg0: i32) -> (i32, i32) {
    %c0_i32 = arith.constant 0 : i32
    %c0_i32_0 = arith.constant 0 : i32
    return %arg0, %c0_i32 : i32, i32
  }
}

</mosaic_0001>

<bundles_post_ra>
// kernel: mtfusion.1
= control target key start
LH: loop header
LB: loop body
LE: loop exit
PB: predicated region body
PF: predicated region fallthrough
CT: control target
= control target key end

     0   :  { %9 = vsyncpa [#allocation3], 0  ;;  %s759_s0 = inlined_call_operand.hbm [shape: f32[8,32], index: 0, kind: input, shape index: {}]   ;;  %s760_s1 = inlined_call_operand.hbm [shape: f32[8,64], index: 1, kind: input, shape index: {}]   ;;  %s761_s2 = inlined_call_operand.hbm [shape: f32[33,512], index: 2, kind: input, shape index: {}]   ;;  %s762_s3 = inlined_call_operand.hbm [shape: f32[65,512], index: 3, kind: input, shape index: {}]   ;;  %s763_s4 = inlined_call_operand.hbm [shape: f32[8,128], index: 4, kind: output, shape index: {}]  }
   0x1   :  { %10 = vsyncpa [#allocation6], 0 }
   0x2   :  { %11 = vsyncpa [#allocation9], 0 }
   0x3   :  { %12 = vsyncpa [#allocation4], 0  ;;  %s660_s15 = smov [#allocation5]   ;;  %s661_s17 = smov [#allocation2]  }
   0x4   :  { %s29_s16 = sshll.u32 %s660_s15, 4  ;;  %s19_s18 = sshll.u32 %s661_s17, 4  ;;  %s30_s16 = int_to_ptr.vmem [resolvable:$true] %s29_s16  ;;  %s20_s18 = int_to_ptr.vmem [resolvable:$true] %s19_s18 }
   0x5   :  { %s542_s21 = scalar_lea.hbm %s760_s1, 128 }
   0x6   :  { %p543_p0 = scmp.ne.s32.totalorder %s760_s1, %s542_s21  ;;  %p546_p1 = scmp.lt.u32.totalorder %s542_s21, %s760_s1 }
   0x8   :  { %p548_p2 = pnand %p546_p1, %p543_p0 }
   0xa   :  { %551 = shalt.err (!%p548_p2)
}
   0xb   :  { %s552_s26 = scalar_lea.vmem %s30_s16, 128  ;;  %p557_p4 = scmp.lt.s32.totalorder %s30_s16, %s30_s16 }
   0xc   :  { %p553_p3 = scmp.ne.s32.totalorder %s30_s16, %s552_s26  ;;  %p558_p5 = scmp.lt.s32.totalorder %s552_s26, %s552_s26 }
   0xe   :  { %p559_p6 = por %p558_p5, %p557_p4 }
  0x10   :  { %p560_p7 = pnand %p559_p6, %p553_p3 }
  0x12   :  { %563 = shalt.err (!%p560_p7)
}
  0x13   :  { %32 = dma.hbm_to_vmem [thread:$0]  %s760_s1, 128, %s30_s16, [#allocation6]  }
  0x14   :  { %s564_s5 = scalar_lea.hbm %s759_s0, 128 }
  0x15   :  { %p565_p8 = scmp.ne.s32.totalorder %s759_s0, %s564_s5  ;;  %p568_p9 = scmp.lt.u32.totalorder %s564_s5, %s759_s0 }
  0x17   :  { %p570_p10 = pnand %p568_p9, %p565_p8 }
  0x19   :  { %573 = shalt.err (!%p570_p10)
}
  0x1a   :  { %s574_s10 = scalar_lea.vmem %s20_s18, 128  ;;  %p579_p12 = scmp.lt.s32.totalorder %s20_s18, %s20_s18 }
  0x1b   :  { %p575_p11 = scmp.ne.s32.totalorder %s20_s18, %s574_s10  ;;  %p580_p13 = scmp.lt.s32.totalorder %s574_s10, %s574_s10 }
  0x1d   :  { %p581_p0 = por %p580_p13, %p579_p12 }
  0x1f   :  { %p582_p1 = pnand %p581_p0, %p575_p11 }
  0x21   :  { %585 = shalt.err (!%p582_p1)
}
  0x22   :  { %22 = dma.hbm_to_vmem [thread:$0]  %s759_s0, 128, %s20_s18, [#allocation3]  }
  0x23   :  { %s662_s12 = smov [#allocation7]   ;;  %s586_s16 = scalar_lea.hbm %s761_s2, 2560 }
  0x24   :  { %s38_s13 = sshll.u32 %s662_s12, 4  ;;  %p587_p2 = scmp.ne.s32.totalorder %s761_s2, %s586_s16  ;;  %s39_s13 = int_to_ptr.vmem [resolvable:$true] %s38_s13 }
  0x25   :  { %p590_p3 = scmp.lt.u32.totalorder %s586_s16, %s761_s2 }
  0x27   :  { %p592_p4 = pnand %p590_p3, %p587_p2 }
  0x29   :  { %595 = shalt.err (!%p592_p4)
}
  0x2a   :  { %s596_s22 = scalar_lea.vmem %s39_s13, 2560  ;;  %p601_p6 = scmp.lt.s32.totalorder %s39_s13, %s39_s13 }
  0x2b   :  { %p597_p5 = scmp.ne.s32.totalorder %s39_s13, %s596_s22  ;;  %p602_p7 = scmp.lt.s32.totalorder %s596_s22, %s596_s22 }
  0x2d   :  { %p603_p8 = por %p602_p7, %p601_p6 }
  0x2f   :  { %p604_p9 = pnand %p603_p8, %p597_p5 }
  0x31   :  { %607 = shalt.err (!%p604_p9)
}
  0x32   :  { %s663_s0 = smov 512   ;;  %s664_s18 = smov 32  }
  0x33   :  { %44 = dma.hbm_to_vmem [thread:$0]  %s761_s2, 2560, %s39_s13, [#allocation6], %s663_s0, %s663_s0, %s664_s18  }
  0x34   :  { %s665_s25 = smov [#allocation8]   ;;  %s608_s29 = scalar_lea.hbm %s762_s3, 4608 }
  0x35   :  { %s50_s26 = sshll.u32 %s665_s25, 4  ;;  %p609_p10 = scmp.ne.s32.totalorder %s762_s3, %s608_s29  ;;  %s51_s26 = int_to_ptr.vmem [resolvable:$true] %s50_s26 }
  0x36   :  { %p612_p11 = scmp.lt.u32.totalorder %s608_s29, %s762_s3 }
  0x38   :  { %p614_p12 = pnand %p612_p11, %p609_p10 }
  0x3a   :  { %617 = shalt.err (!%p614_p12)
}
  0x3b   :  { %s618_s8 = scalar_lea.vmem %s51_s26, 4608  ;;  %p623_p0 = scmp.lt.s32.totalorder %s51_s26, %s51_s26 }
  0x3c   :  { %p619_p13 = scmp.ne.s32.totalorder %s51_s26, %s618_s8  ;;  %p624_p1 = scmp.lt.s32.totalorder %s618_s8, %s618_s8 }
  0x3e   :  { %p625_p2 = por %p624_p1, %p623_p0 }
  0x40   :  { %p626_p3 = pnand %p625_p2, %p619_p13 }
  0x42   :  { %629 = shalt.err (!%p626_p3)
}
  0x43   :  { %56 = dma.hbm_to_vmem [thread:$0]  %s762_s3, 4608, %s51_s26, [#allocation9], %s663_s0, %s663_s0, %s664_s18  }
  0x44   :  { %652 = dma.done.wait [#allocation3], 128  }
  0x45   :  { %653 = vsyncadd [#allocation3], 4294967168 }
  0x46   :  { %654 = dma.done.wait [#allocation6], 2688  }
  0x47   :  { %655 = vsyncadd [#allocation6], 4294964608 }
  0x48   :  { %656 = dma.done.wait [#allocation9], 4608  }
  0x49   :  { %657 = vsyncadd [#allocation9], 4294962688  ;;  %v666_v0 = vmov 0.0   ;;  %v71_v1 = vld [vmem:[#allocation7 + $0x8] sm:$0xff]  ;;  %v73_v3 = vld [vmem:[#allocation7 + $0x18] sm:$0xff]  ;;  %vm109_vm0 = vcmask 261120  }
  0x4a   :  { %177 = vmatprep.mubr.f32.mxu0 %v666_v0  ;;  %248 = vmatprep.mubr.f32.mxu1 %v666_v0  ;;  %v75_v2 = vld [vmem:[#allocation7 + $0x28] sm:$0xff]  ;;  %v77_v5 = vld [vmem:[#allocation7 + $0x38] sm:$0xff]  ;;  %v70_v6 = vld [vmem:[#allocation7] sm:$0xff]  ;;  %vm311_vm1 = vcmask 523264   ;;  %s667_s3 = smov [#allocation10]  }
  0x4b   :  { %v486_v4 = vpack.c.bf16 %v75_v2, %v71_v1  ;;  %v74_v7 = vld [vmem:[#allocation7 + $0x20] sm:$0xff]  ;;  %v494_v8 = vpack.c.bf16 %v77_v5, %v73_v3  ;;  %v72_v10 = vld [vmem:[#allocation7 + $0x10] sm:$0xff]  ;;  %v79_v12 = vld [vmem:[#allocation7 + $0x48] sm:$0xff]  ;;  %s471_s10 = sshll.u32 %s667_s3, 4  ;;  %s472_s10 = int_to_ptr.vmem [resolvable:$true] %s471_s10 }
  0x4c   :  { %v488_v9 = vpack.c.bf16 %v74_v7, %v70_v6  ;;  %v76_v11 = vld [vmem:[#allocation7 + $0x30] sm:$0xff]  ;;  %v83_v14 = vld [vmem:[#allocation7 + $0x68] sm:$0xff]  ;;  %v81_v15 = vld [vmem:[#allocation7 + $0x58] sm:$0xff]  ;;  %s630_s1 = scalar_lea.vmem %s472_s10, 128  ;;  %p635_p5 = scmp.lt.s32.totalorder %s472_s10, %s472_s10 }
  0x4d   :  { %487 = vmatprep.subr.bf16.mxu0 %v486_v4  ;;  %v496_v13 = vpack.c.bf16 %v76_v11, %v72_v10  ;;  %v85_v16 = vld [vmem:[#allocation7 + $0x78] sm:$0xff]  ;;  %495 = vmatprep.subr.bf16.mxu1 %v494_v8  ;;  %v490_v17 = vpack.c.bf16 %v83_v14, %v79_v12  ;;  %v78_v19 = vld [vmem:[#allocation7 + $0x40] sm:$0xff]  ;;  %v80_v21 = vld [vmem:[#allocation7 + $0x50] sm:$0xff]  ;;  %v89_v12 = vlaneseq  ;;  %p631_p4 = scmp.ne.s32.totalorder %s472_s10, %s630_s1  ;;  %p636_p6 = scmp.lt.s32.totalorder %s630_s1, %s630_s1 }
  0x4e   :  { %489 = vmatpush1.bf16.msra.mxu0 %v488_v9  ;;  %v498_v18 = vpack.c.bf16 %v85_v16, %v81_v15  ;;  %v82_v20 = vld [vmem:[#allocation7 + $0x60] sm:$0xff]  ;;  %v84_v23 = vld [vmem:[#allocation7 + $0x70] sm:$0xff]  ;;  %v257_v24 = vld [vmem:[#allocation8 + $0x8] sm:$0xff] }
  0x4f   :  { %497 = vmatpush1.bf16.msra.mxu1 %v496_v13  ;;  %v492_v22 = vpack.c.bf16 %v82_v20, %v78_v19  ;;  %491 = vmatprep.subr.bf16.mxu0 %v490_v17  ;;  %v500_v25 = vpack.c.bf16 %v84_v23, %v80_v21  ;;  %v69_v26 = vld [vmem:[#allocation2] sm:$0xff]  ;;  %v261_v27 = vld [vmem:[#allocation8 + $0x28] sm:$0xff]  ;;  %v259_v28 = vld [vmem:[#allocation8 + $0x18] sm:$0xff]  ;;  %v90_v16 = vshrl.u32 %v89_v12, 7  ;;  %p637_p7 = por %p636_p6, %p635_p5 }
  0x50   :  { %499 = vmatprep.subr.bf16.mxu1 %v498_v18  ;;  %v263_v29 = vld [vmem:[#allocation8 + $0x38] sm:$0xff]  ;;  %v502_v30 = vpack.c.bf16 %v261_v27, %v257_v24  ;;  %v256_v32 = vld [vmem:[#allocation8] sm:$0xff]  ;;  %v258_v34 = vld [vmem:[#allocation8 + $0x10] sm:$0xff] }
  0x51   :  { %v518_v31 = vpack.c.bf16 %v263_v29, %v259_v28  ;;  %v260_v33 = vld [vmem:[#allocation8 + $0x20] sm:$0xff]  ;;  %v262_v36 = vld [vmem:[#allocation8 + $0x30] sm:$0xff]  ;;  %v265_v37 = vld [vmem:[#allocation8 + $0x48] sm:$0xff]  ;;  %v91_v18 = vsub.s32 0, %v90_v16  ;;  %v99_v19 = vsub.s32 2, %v90_v16  ;;  %v95_v20 = vsub.s32 1, %v90_v16  ;;  %p638_p8 = pnand %p637_p7, %p631_p4 }
  0x52   :  { %493 = vmatpush1.bf16.msra.mxu0 %v492_v22  ;;  %v504_v35 = vpack.c.bf16 %v260_v33, %v256_v32  ;;  %v269_v38 = vld [vmem:[#allocation8 + $0x68] sm:$0xff]  ;;  %v520_v39 = vpack.c.bf16 %v262_v36, %v258_v34  ;;  %v267_v41 = vld [vmem:[#allocation8 + $0x58] sm:$0xff]  ;;  %v264_v43 = vld [vmem:[#allocation8 + $0x40] sm:$0xff]  ;;  %v103_v22 = vsub.s32 3, %v90_v16 }
  0x53   :  { %501 = vmatpush1.bf16.msra.mxu1 %v500_v25  ;;  %503 = vmatprep.subr.bf16.mxu0 %v502_v30  ;;  %v506_v40 = vpack.c.bf16 %v269_v38, %v265_v37  ;;  %v271_v42 = vld [vmem:[#allocation8 + $0x78] sm:$0xff]  ;;  %v268_v45 = vld [vmem:[#allocation8 + $0x60] sm:$0xff]  ;;  %v266_v46 = vld [vmem:[#allocation8 + $0x50] sm:$0xff] }
  0x54   :  { %519 = vmatprep.subr.bf16.mxu1 %v518_v31  ;;  %v522_v44 = vpack.c.bf16 %v271_v42, %v267_v41  ;;  %v270_v47 = vld [vmem:[#allocation8 + $0x70] sm:$0xff]  ;;  %v273_v48 = vld [vmem:[#allocation8 + $0x88] sm:$0xff]  ;;  %v275_v50 = vld [vmem:[#allocation8 + $0x98] sm:$0xff]  ;;  %v508_v51 = vpack.c.bf16 %v268_v45, %v264_v43 }
  0x55   :  { %482 = vmatmul.mubr.msk.f32.vlgmr.msra.gmra.mrb[0].mxu0 %vm109_vm0, %v69_v26  ;;  %v277_v49 = vld [vmem:[#allocation8 + $0xa8] sm:$0xff]  ;;  %v279_v52 = vld [vmem:[#allocation8 + $0xb8] sm:$0xff]  ;;  %v524_v53 = vpack.c.bf16 %v270_v47, %v266_v46  ;;  %v272_v55 = vld [vmem:[#allocation8 + $0x80] sm:$0xff] }
  0x56   :  { %483 = vmatmul.mubr.msk.f32.vlgmr.msra.gmra.mrb[0].mxu1 %vm109_vm0, %v69_v26  ;;  %505 = vmatpush1.bf16.msra.mxu0 %v504_v35  ;;  %v510_v54 = vpack.c.bf16 %v277_v49, %v273_v48  ;;  %v276_v56 = vld [vmem:[#allocation8 + $0xa0] sm:$0xff]  ;;  %v274_v57 = vld [vmem:[#allocation8 + $0x90] sm:$0xff]  ;;  %v526_v58 = vpack.c.bf16 %v279_v52, %v275_v50  ;;  %v281_v60 = vld [vmem:[#allocation8 + $0xc8] sm:$0xff] }
  0x57   :  { %521 = vmatpush1.bf16.msra.mxu1 %v520_v39  ;;  %507 = vmatprep.subr.bf16.mxu0 %v506_v40  ;;  %v278_v59 = vld [vmem:[#allocation8 + $0xb0] sm:$0xff]  ;;  %v285_v61 = vld [vmem:[#allocation8 + $0xe8] sm:$0xff]  ;;  %v283_v62 = vld [vmem:[#allocation8 + $0xd8] sm:$0xff]  ;;  %v512_v1 = vpack.c.bf16 %v276_v56, %v272_v55 }
  0x58   :  { %523 = vmatprep.subr.bf16.mxu1 %v522_v44  ;;  %379 = vmatprep.mubr.f32.mxu0 %v666_v0  ;;  %v287_v63 = vld [vmem:[#allocation8 + $0xf8] sm:$0xff]  ;;  %v528_v2 = vpack.c.bf16 %v278_v59, %v274_v57  ;;  %v514_v3 = vpack.c.bf16 %v285_v61, %v281_v60  ;;  %v280_v4 = vld [vmem:[#allocation8 + $0xc0] sm:$0xff]  ;;  %v282_v7 = vld [vmem:[#allocation8 + $0xd0] sm:$0xff] }
  0x59   :  { %450 = vmatprep.mubr.f32.mxu1 %v666_v0  ;;  %v284_v5 = vld [vmem:[#allocation8 + $0xe0] sm:$0xff]  ;;  %v530_v6 = vpack.c.bf16 %v287_v63, %v283_v62  ;;  %v286_v8 = vld [vmem:[#allocation8 + $0xf0] sm:$0xff]  ;;  %v255_v0 = vld [vmem:[#allocation5] sm:$0xff] }
  0x5a   :  { %509 = vmatpush1.bf16.msra.mxu0 %v508_v51  ;;  %v516_v9 = vpack.c.bf16 %v284_v5, %v280_v4  ;;  %v532_v10 = vpack.c.bf16 %v286_v8, %v282_v7  ;;  %v87_v17 = vld [vmem:[#allocation7 + $0x80] ss:$8 sm:$0xf] }
  0x5b   :  { %525 = vmatpush1.bf16.msra.mxu1 %v524_v53  ;;  %511 = vmatprep.subr.bf16.mxu0 %v510_v54  ;;  %v289_v21 = vld [vmem:[#allocation8 + $0x100] ss:$8 sm:$0xf]  ;;  %v92_v23 = vrot.slane %v87_v17, %v91_v18  ;;  %v100_v25 = vrot.slane %v87_v17, %v99_v19  ;;  %v96_v26 = vrot.slane %v87_v17, %v95_v20 }
  0x5c   :  { %527 = vmatprep.subr.bf16.mxu1 %v526_v58  ;;  %v294_v24 = vrot.slane %v289_v21, %v91_v18  ;;  %v302_v27 = vrot.slane %v289_v21, %v99_v19  ;;  %v298_v28 = vrot.slane %v289_v21, %v95_v20  ;;  %v104_v29 = vrot.slane %v87_v17, %v103_v22 }
  0x5d   :  { %v306_v30 = vrot.slane %v289_v21, %v103_v22 }
  0x5e   :  { %513 = vmatpush1.bf16.msra.mxu0 %v512_v1 }
  0x5f   :  { %529 = vmatpush1.bf16.msra.mxu1 %v528_v2  ;;  %515 = vmatprep.subr.bf16.mxu0 %v514_v3 }
  0x60   :  { %531 = vmatprep.subr.bf16.mxu1 %v530_v6 }
  0x62   :  { %517 = vmatpush1.bf16.msra.mxu0 %v516_v9 }
  0x63   :  { %533 = vmatpush1.bf16.msra.mxu1 %v532_v10 }
  0x65   :  { %484 = vmatmul.mubr.msk.f32.vlgmr.msra.gmra.mrb[2].mxu0 %vm311_vm1, %v255_v0 }
  0x66   :  { %485 = vmatmul.mubr.msk.f32.vlgmr.msra.gmra.mrb[2].mxu1 %vm311_vm1, %v255_v0 }
 0x128   :  { %v179_v11 = vpop.f32.mrb[0].mxu0 }
 0x129   :  { %v250_v13 = vpop.f32.mrb[0].mxu1  ;;  %v181_v14 = vpop.f32.mrb[1].mxu0  ;;  %v180_v32 = vadd.f32 %v179_v11, %v92_v23 }
 0x12a   :  { %v252_v15 = vpop.f32.mrb[1].mxu1  ;;  %v251_v36 = vadd.f32 %v250_v13, %v100_v25  ;;  %v182_v37 = vadd.f32 %v181_v14, %v96_v26 }
 0x12b   :  { %v253_v41 = vadd.f32 %v252_v15, %v104_v29 }
 0x138   :  { %v381_v31 = vpop.f32.mrb[2].mxu0 }
 0x139   :  { %v382_v33 = vadd.f32 %v381_v31, %v294_v24  ;;  %v452_v34 = vpop.f32.mrb[2].mxu1  ;;  %v383_v35 = vpop.f32.mrb[3].mxu0 }
 0x13a   :  { %v453_v38 = vadd.f32 %v452_v34, %v302_v27  ;;  %v384_v39 = vadd.f32 %v383_v35, %v298_v28  ;;  %v454_v40 = vpop.f32.mrb[3].mxu1 }
 0x13b   :  { %v457_v42 = vmul.f32 %v382_v33, %v180_v32  ;;  %v455_v43 = vadd.f32 %v454_v40, %v306_v30 }
 0x13c   :  { %v459_v44 = vmul.f32 %v453_v38, %v251_v36  ;;  %v458_v45 = vmul.f32 %v384_v39, %v182_v37 }
 0x13d   :  { %v460_v46 = vmul.f32 %v455_v43, %v253_v41 }
 0x13e   :  { %v461_v47 = vadd.f32 %v458_v45, %v457_v42 }
 0x13f   :  { %v462_v48 = vadd.f32 %v460_v46, %v459_v44 }
 0x141   :  { %v463_v49 = vadd.f32 %v462_v48, %v461_v47 }
 0x143   :  { %464 = vst [vmem:[#allocation10] sm:$0xff] %v463_v49 }
 0x144   :  { %641 = shalt.err (!%p638_p8)
}
 0x145   :  { %s642_s13 = scalar_lea.hbm %s763_s4, 128 }
 0x146   :  { %p643_p9 = scmp.ne.s32.totalorder %s763_s4, %s642_s13  ;;  %p646_p10 = scmp.lt.u32.totalorder %s642_s13, %s763_s4 }
 0x148   :  { %p648_p11 = pnand %p646_p10, %p643_p9 }
 0x14a   :  { %651 = shalt.err (!%p648_p11)
}
 0x14b   :  { %474 = dma.vmem_to_hbm [thread:$0]  %s472_s10, 128, %s763_s4, [#allocation4]  }
 0x14c   :  { %658 = dma.done.wait [#allocation4], 128  }
 0x14d   :  { %659 = vsyncadd [#allocation4], 4294967168 }
 0x14e   :  { %478 = vsyncpa [#allocation3], 1 }
 0x14f   :  { %479 = vsyncpa [#allocation6], 1 }
 0x150   :  { %480 = vsyncpa [#allocation9], 1 }
 0x151   :  { %481 = vsyncpa [#allocation4], 1 }

</bundles_post_ra>
